<compile_context>
chip_gen: v5e
topology: v5e:2x2
jax: 0.10.0
libtpu: 0.0.40
codegen_flags: <defaults>
</compile_context>

<pallas_src>
import jax
import jax.numpy as jnp
from jax.experimental import pallas as pl
from jax.experimental.pallas import tpu as pltpu

K = 64  # self.k in the module


def _atd_kernel(wblk_ref, wres_ref, xs_ref, xt_ref, out_ref):
    """One grid step = one batch element. Writes that batch's partial loss."""
    xs = xs_ref[0]            # (C, N)  student features
    xt = xt_ref[0]            # (C, N)  teacher features
    wblk = wblk_ref[...]      # (2K, 2C) block-diag of (w0_s, w0_t)
    wres = wres_ref[...]      # (C, K)  linear_re_s weight (shared by both branches)

    c = xs.shape[0]
    n = xs.shape[1]

    # ---------------- stage 1: fused block-diagonal projection ----------------
    # [ys; yt] = [[w0s, 0], [0, w0t]] @ [xs; xt]
    x_cat = jnp.concatenate([xs, xt], axis=0)                             # (2C, N)
    y_cat = jnp.dot(wblk, x_cat, preferred_element_type=jnp.float32)      # (2K, N)
    ys = y_cat[:K, :]                                                     # (K, N)
    yt = y_cat[K:, :]                                                     # (K, N)

    # ---------------- student branch ----------------
    # softmax over spatial dim (-1), then renormalize by sum over k.
    ms = jnp.max(ys, axis=-1, keepdims=True)                              # (K, 1)
    es = jnp.exp(ys - ms)                                                 # (K, N)
    inv_row = 1.0 / jnp.sum(es, axis=-1, keepdims=True)                   # (K, 1)
    soft_s = es * inv_row                                                 # (K, N)
    inv_den = 1.0 / (1e-9 + jnp.sum(soft_s, axis=0, keepdims=True))       # (1, N)
    mult_s = ys * soft_s * inv_den                                        # (K, N)

    # ---------------- teacher branch ----------------
    # softmax over k (dim=1 in (B,K,N)); its column sums are == 1, so the
    # second renormalization is a divide by (1 + 1e-9): fold into a constant.
    mt = jnp.max(yt, axis=0, keepdims=True)                               # (1, N)
    et = jnp.exp(yt - mt)                                                 # (K, N)
    inv_col = (1.0 / (1.0 + 1e-9)) / jnp.sum(et, axis=0, keepdims=True)   # (1, N)
    mult_t = yt * (et * inv_col)                                          # (K, N)

    # ---------------- stage 2: shared-LHS matmul, fused along the lane axis ----
    # NOTE: the PyTorch code uses linear_re_s (student weight) for the teacher too.
    mult_cat = jnp.concatenate([mult_s, mult_t], axis=-1)                 # (K, 2N)
    at_cat = jnp.dot(wres, mult_cat, preferred_element_type=jnp.float32)  # (C, 2N)
    at_s = at_cat[:, :n] + xs                                             # (C, N)
    at_t = at_cat[:, n:] + xt                                             # (C, N)

    # ---------------- attention-transfer loss (per-batch partial) ----------------
    # at(f) = F.normalize(f.pow(2).mean(1).view(B, -1)) -> per-batch (N,) map.
    inv_c = 1.0 / jnp.float32(c)
    a_s = jnp.sum(at_s * at_s, axis=0, keepdims=True) * inv_c             # (1, N)
    a_t = jnp.sum(at_t * at_t, axis=0, keepdims=True) * inv_c             # (1, N)

    # Scalar L2 norms (F.normalize eps = 1e-12): exact sqrt + scalar reciprocal.
    inv_ns = 1.0 / jnp.maximum(jnp.sqrt(jnp.sum(a_s * a_s)), 1e-12)
    inv_nt = 1.0 / jnp.maximum(jnp.sqrt(jnp.sum(a_t * a_t)), 1e-12)
    diff = a_s * inv_ns - a_t * inv_nt                                    # (1, N)
    partial = jnp.sum(diff * diff)                                        # scalar

    # Lane-dense, tile-aligned write: fill this batch's (1, 8, 128) output slab.
    out_ref[...] = jnp.full(out_ref.shape, partial, dtype=jnp.float32)


@jax.jit
def atd_forward(student, teacher, w0_s, wre_s, w0_t):
    """student, teacher: (B, C, H, W) float32. Returns scalar loss."""
    B, C, H, W = student.shape
    N = H * W
    xs = student.reshape(B, C, N).astype(jnp.float32)
    xt = teacher.reshape(B, C, N).astype(jnp.float32)

    # Fused first-stage weight: block_diag(w0_s, w0_t) -> (2K, 2C).
    zeros = jnp.zeros((K, C), jnp.float32)
    w_blk = jnp.concatenate(
        [jnp.concatenate([w0_s, zeros], axis=1),
         jnp.concatenate([zeros, w0_t], axis=1)],
        axis=0,
    )

    partials = pl.pallas_call(
        _atd_kernel,
        out_shape=jax.ShapeDtypeStruct((B, 8, 128), jnp.float32),
        grid_spec=pltpu.PrefetchScalarGridSpec(
            num_scalar_prefetch=0,
            grid=(B,),
            in_specs=[
                pl.BlockSpec((2 * K, 2 * C), lambda b: (0, 0)),   # block-diag w0
                pl.BlockSpec((C, K), lambda b: (0, 0)),           # wre_s
                pl.BlockSpec((1, C, N), lambda b: (b, 0, 0)),     # student (B,C,N)
                pl.BlockSpec((1, C, N), lambda b: (b, 0, 0)),     # teacher (B,C,N)
            ],
            out_specs=pl.BlockSpec((1, 8, 128), lambda b: (b, 0, 0)),
        ),
        compiler_params=pltpu.CompilerParams(
            dimension_semantics=("parallel",),      # batch shards across TCs
            vmem_limit_bytes=48 * 1024 * 1024,
        ),
    )(w_blk, wre_s, xs, xt)

    # mean over all (B * H * W) elements
    return jnp.sum(partials[:, 0, 0]) / jnp.float32(B * N)


def _reference(student, teacher, w0_s, wre_s, w0_t):
    """Pure-JAX reference mirroring the PyTorch forward, for sanity checking."""
    B, C, H, W = student.shape
    N = H * W
    xs = student.reshape(B, C, N)
    xt = teacher.reshape(B, C, N)

    ys = jnp.einsum("kc,bcn->bkn", w0_s, xs)
    soft_s = jax.nn.softmax(ys, axis=-1)
    soft_s = soft_s / (1e-9 + soft_s.sum(axis=1, keepdims=True))
    at_s = jnp.einsum("ck,bkn->bcn", wre_s, ys * soft_s) + xs

    yt = jnp.einsum("kc,bcn->bkn", w0_t, xt)
    soft_t = jax.nn.softmax(yt, axis=1)
    soft_t = soft_t / (1e-9 + soft_t.sum(axis=1, keepdims=True))
    at_t = jnp.einsum("ck,bkn->bcn", wre_s, yt * soft_t) + xt  # linear_re_s!

    def at_map(f):
        a = jnp.mean(f * f, axis=1).reshape(B, -1)
        norm = jnp.maximum(jnp.sqrt(jnp.sum(a * a, axis=1, keepdims=True)), 1e-12)
        return a / norm

    d = at_map(at_s) - at_map(at_t)
    return jnp.mean(d * d)


if __name__ == "__main__":
    # Small shapes: batch=2, channels=8, spatial=16x16  (N = 256)
    B, C, H, W = 2, 8, 16, 16

    key = jax.random.PRNGKey(0)
    k1, k2, k3, k4, k5 = jax.random.split(key, 5)

    student = jax.random.normal(k1, (B, C, H, W), dtype=jnp.float32)
    teacher = jax.random.normal(k2, (B, C, H, W), dtype=jnp.float32)

    # Deterministic "Conv1d(k=1, bias=False)" weights (kaiming-uniform-like).
    bound_c = 1.0 / jnp.sqrt(jnp.float32(C))
    bound_k = 1.0 / jnp.sqrt(jnp.float32(K))
    w0_s = jax.random.uniform(k3, (K, C), jnp.float32, -bound_c, bound_c)
    wre_s = jax.random.uniform(k4, (C, K), jnp.float32, -bound_k, bound_k)
    w0_t = jax.random.uniform(k5, (K, C), jnp.float32, -bound_c, bound_c)
    # linear_1_s / linear_1_t share weights with linear_0_s / linear_0_t (as in __init__).
    # linear_re_t is allocated in the PyTorch module but never used in forward.

    loss = atd_forward(student, teacher, w0_s, wre_s, w0_t)
    loss = jax.block_until_ready(loss)

    ref = _reference(student, teacher, w0_s, wre_s, w0_t)
    assert jnp.allclose(loss, ref, rtol=1e-3, atol=1e-6), (loss, ref)

    print("KERNEL_OK")
</pallas_src>

<mosaic_0001>
module attributes {stable_mosaic.version = 11 : i64} {
  func.func @_atd_kernel(%arg0: i32, %arg1: memref<128x16xf32, #tpu.memory_space<vmem>>, %arg2: memref<8x64xf32, #tpu.memory_space<vmem>>, %arg3: memref<1x8x256xf32, #tpu.memory_space<vmem>>, %arg4: memref<1x8x256xf32, #tpu.memory_space<vmem>>, %arg5: memref<1x8x128xf32, #tpu.memory_space<vmem>>) attributes {dimension_semantics = [#tpu.dimension_semantics<parallel>], iteration_bounds = array<i64: 2>, scalar_prefetch = 0 : i64, scratch_operands = 0 : i64, tpu.core_type = #tpu.core_type<tc>, window_params = [{pipeline_mode = #tpu.pipeline_mode<synchronous>, transform_indices = @transform_0, window_bounds = array<i64: 128, 16>}, {pipeline_mode = #tpu.pipeline_mode<synchronous>, transform_indices = @transform_1, window_bounds = array<i64: 8, 64>}, {transform_indices = @transform_2, window_bounds = array<i64: 1, 8, 256>}, {transform_indices = @transform_3, window_bounds = array<i64: 1, 8, 256>}, {transform_indices = @transform_4, window_bounds = array<i64: 1, 8, 128>}]} {
    %c0 = arith.constant 0 : index
    %c0_0 = arith.constant 0 : index
    %c0_1 = arith.constant 0 : index
    %0 = vector.load %arg3[%c0, %c0_0, %c0_1] : memref<1x8x256xf32, #tpu.memory_space<vmem>>, vector<1x8x256xf32>
    %1 = vector.shape_cast %0 : vector<1x8x256xf32> to vector<8x256xf32>
    %c0_2 = arith.constant 0 : index
    %c0_3 = arith.constant 0 : index
    %c0_4 = arith.constant 0 : index
    %2 = vector.load %arg4[%c0_2, %c0_3, %c0_4] : memref<1x8x256xf32, #tpu.memory_space<vmem>>, vector<1x8x256xf32>
    %3 = vector.shape_cast %2 : vector<1x8x256xf32> to vector<8x256xf32>
    %c0_5 = arith.constant 0 : index
    %c0_6 = arith.constant 0 : index
    %4 = vector.load %arg1[%c0_5, %c0_6] : memref<128x16xf32, #tpu.memory_space<vmem>>, vector<128x16xf32>
    %c0_7 = arith.constant 0 : index
    %c0_8 = arith.constant 0 : index
    %5 = vector.load %arg2[%c0_7, %c0_8] : memref<8x64xf32, #tpu.memory_space<vmem>>, vector<8x64xf32>
    %6 = tpu.concatenate %1, %3 in 0 : vector<8x256xf32>, vector<8x256xf32> -> vector<16x256xf32>
    %cst = arith.constant dense<0.000000e+00> : vector<128x256xf32>
    %7 = tpu.matmul %4, %6, %cst {dimension_numbers = #tpu.dot_dimension_numbers<[1], [0], [0], [1], [0, 0, 1, 1], [], []>} : vector<128x16xf32>, vector<16x256xf32>, vector<128x256xf32> -> vector<128x256xf32>
    %8 = vector.extract_strided_slice %7 {offsets = [0, 0], sizes = [64, 256], strides = [1, 1]} : vector<128x256xf32> to vector<64x256xf32>
    %9 = vector.extract_strided_slice %7 {offsets = [64, 0], sizes = [64, 256], strides = [1, 1]} : vector<128x256xf32> to vector<64x256xf32>
    %cst_9 = arith.constant dense<0xFF800000> : vector<64xf32>
    %10 = vector.multi_reduction <maximumf>, %8, %cst_9 [1] : vector<64x256xf32> to vector<64xf32>
    %11 = vector.shape_cast %10 : vector<64xf32> to vector<64x1xf32>
    %12 = vector.broadcast %11 : vector<64x1xf32> to vector<64x256xf32>
    %13 = arith.subf %8, %12 : vector<64x256xf32>
    %14 = math.exp %13 : vector<64x256xf32>
    %cst_10 = arith.constant dense<0.000000e+00> : vector<64xf32>
    %15 = vector.multi_reduction <add>, %14, %cst_10 [1] : vector<64x256xf32> to vector<64xf32>
    %16 = vector.shape_cast %15 : vector<64xf32> to vector<64x1xf32>
    %cst_11 = arith.constant 1.000000e+00 : f32
    %17 = vector.broadcast %cst_11 : f32 to vector<64x1xf32>
    %18 = arith.divf %17, %16 : vector<64x1xf32>
    %19 = vector.broadcast %18 : vector<64x1xf32> to vector<64x256xf32>
    %20 = arith.mulf %14, %19 : vector<64x256xf32>
    %cst_12 = arith.constant dense<0.000000e+00> : vector<256xf32>
    %21 = vector.multi_reduction <add>, %20, %cst_12 [0] : vector<64x256xf32> to vector<256xf32>
    %22 = vector.shape_cast %21 : vector<256xf32> to vector<1x256xf32>
    %cst_13 = arith.constant 9.99999971E-10 : f32
    %23 = vector.broadcast %cst_13 : f32 to vector<1x256xf32>
    %24 = arith.addf %23, %22 : vector<1x256xf32>
    %cst_14 = arith.constant 1.000000e+00 : f32
    %25 = vector.broadcast %cst_14 : f32 to vector<1x256xf32>
    %26 = arith.divf %25, %24 : vector<1x256xf32>
    %27 = arith.mulf %8, %20 : vector<64x256xf32>
    %28 = vector.broadcast %26 : vector<1x256xf32> to vector<64x256xf32>
    %29 = arith.mulf %27, %28 : vector<64x256xf32>
    %cst_15 = arith.constant dense<0xFF800000> : vector<256xf32>
    %30 = vector.multi_reduction <maximumf>, %9, %cst_15 [0] : vector<64x256xf32> to vector<256xf32>
    %31 = vector.shape_cast %30 : vector<256xf32> to vector<1x256xf32>
    %32 = vector.broadcast %31 : vector<1x256xf32> to vector<64x256xf32>
    %33 = arith.subf %9, %32 : vector<64x256xf32>
    %34 = math.exp %33 : vector<64x256xf32>
    %cst_16 = arith.constant dense<0.000000e+00> : vector<256xf32>
    %35 = vector.multi_reduction <add>, %34, %cst_16 [0] : vector<64x256xf32> to vector<256xf32>
    %36 = vector.shape_cast %35 : vector<256xf32> to vector<1x256xf32>
    %cst_17 = arith.constant 1.000000e+00 : f32
    %37 = vector.broadcast %cst_17 : f32 to vector<1x256xf32>
    %38 = arith.divf %37, %36 : vector<1x256xf32>
    %39 = vector.broadcast %38 : vector<1x256xf32> to vector<64x256xf32>
    %40 = arith.mulf %34, %39 : vector<64x256xf32>
    %41 = arith.mulf %9, %40 : vector<64x256xf32>
    %42 = tpu.concatenate %29, %41 in 1 : vector<64x256xf32>, vector<64x256xf32> -> vector<64x512xf32>
    %cst_18 = arith.constant dense<0.000000e+00> : vector<8x512xf32>
    %43 = tpu.matmul %5, %42, %cst_18 {dimension_numbers = #tpu.dot_dimension_numbers<[1], [0], [0], [1], [0, 0, 1, 1], [], []>} : vector<8x64xf32>, vector<64x512xf32>, vector<8x512xf32> -> vector<8x512xf32>
    %44 = vector.extract_strided_slice %43 {offsets = [0, 0], sizes = [8, 256], strides = [1, 1]} : vector<8x512xf32> to vector<8x256xf32>
    %45 = arith.addf %44, %1 : vector<8x256xf32>
    %46 = vector.extract_strided_slice %43 {offsets = [0, 256], sizes = [8, 256], strides = [1, 1]} : vector<8x512xf32> to vector<8x256xf32>
    %47 = arith.addf %46, %3 : vector<8x256xf32>
    %cst_19 = arith.constant 1.000000e+00 : f32
    %cst_20 = arith.constant 8.000000e+00 : f32
    %48 = arith.divf %cst_19, %cst_20 : f32
    %49 = arith.mulf %45, %45 : vector<8x256xf32>
    %cst_21 = arith.constant dense<0.000000e+00> : vector<256xf32>
    %50 = vector.multi_reduction <add>, %49, %cst_21 [0] : vector<8x256xf32> to vector<256xf32>
    %51 = vector.shape_cast %50 : vector<256xf32> to vector<1x256xf32>
    %52 = vector.broadcast %48 : f32 to vector<1x256xf32>
    %53 = arith.mulf %51, %52 : vector<1x256xf32>
    %54 = arith.mulf %47, %47 : vector<8x256xf32>
    %cst_22 = arith.constant dense<0.000000e+00> : vector<256xf32>
    %55 = vector.multi_reduction <add>, %54, %cst_22 [0] : vector<8x256xf32> to vector<256xf32>
    %56 = vector.shape_cast %55 : vector<256xf32> to vector<1x256xf32>
    %57 = vector.broadcast %48 : f32 to vector<1x256xf32>
    %58 = arith.mulf %56, %57 : vector<1x256xf32>
    %59 = arith.mulf %53, %53 : vector<1x256xf32>
    %60 = vector.shape_cast %59 : vector<1x256xf32> to vector<1x1x256xf32>
    %cst_23 = arith.constant dense<0.000000e+00> : vector<1xf32>
    %61 = vector.multi_reduction <add>, %60, %cst_23 [1, 2] : vector<1x1x256xf32> to vector<1xf32>
    %62 = vector.shape_cast %61 : vector<1xf32> to vector<1x1x1xf32>
    %63 = vector.extract %62[0, 0, 0] : f32 from vector<1x1x1xf32>
    %64 = math.sqrt %63 : f32
    %cst_24 = arith.constant 9.99999996E-13 : f32
    %65 = arith.maximumf %64, %cst_24 : f32
    %cst_25 = arith.constant 1.000000e+00 : f32
    %66 = arith.divf %cst_25, %65 : f32
    %67 = arith.mulf %58, %58 : vector<1x256xf32>
    %68 = vector.shape_cast %67 : vector<1x256xf32> to vector<1x1x256xf32>
    %cst_26 = arith.constant dense<0.000000e+00> : vector<1xf32>
    %69 = vector.multi_reduction <add>, %68, %cst_26 [1, 2] : vector<1x1x256xf32> to vector<1xf32>
    %70 = vector.shape_cast %69 : vector<1xf32> to vector<1x1x1xf32>
    %71 = vector.extract %70[0, 0, 0] : f32 from vector<1x1x1xf32>
    %72 = math.sqrt %71 : f32
    %cst_27 = arith.constant 9.99999996E-13 : f32
    %73 = arith.maximumf %72, %cst_27 : f32
    %cst_28 = arith.constant 1.000000e+00 : f32
    %74 = arith.divf %cst_28, %73 : f32
    %75 = vector.broadcast %66 : f32 to vector<1x256xf32>
    %76 = arith.mulf %53, %75 : vector<1x256xf32>
    %77 = vector.broadcast %74 : f32 to vector<1x256xf32>
    %78 = arith.mulf %58, %77 : vector<1x256xf32>
    %79 = arith.subf %76, %78 : vector<1x256xf32>
    %80 = arith.mulf %79, %79 : vector<1x256xf32>
    %81 = vector.shape_cast %80 : vector<1x256xf32> to vector<1x1x256xf32>
    %cst_29 = arith.constant dense<0.000000e+00> : vector<1xf32>
    %82 = vector.multi_reduction <add>, %81, %cst_29 [1, 2] : vector<1x1x256xf32> to vector<1xf32>
    %83 = vector.shape_cast %82 : vector<1xf32> to vector<1x1x1xf32>
    %84 = vector.extract %83[0, 0, 0] : f32 from vector<1x1x1xf32>
    %85 = vector.broadcast %84 : f32 to vector<1x8x128xf32>
    %c0_30 = arith.constant 0 : index
    %c0_31 = arith.constant 0 : index
    %c0_32 = arith.constant 0 : index
    %86 = vector.load %arg5[%c0_30, %c0_31, %c0_32] : memref<1x8x128xf32, #tpu.memory_space<vmem>>, vector<1x8x128xf32>
    tpu.vector_store %arg5[%c0_30, %c0_31, %c0_32], %85 {strides = array<i32>} : memref<1x8x128xf32, #tpu.memory_space<vmem>>, vector<1x8x128xf32>,
    return
  }
  func.func @transform_0(%arg0: i32) -> (i32, i32) {
    %c0_i32 = arith.constant 0 : i32
    %c0_i32_0 = arith.constant 0 : i32
    %c0_i32_1 = arith.constant 0 : i32
    return %c0_i32, %c0_i32_0 : i32, i32
  }
  func.func @transform_1(%arg0: i32) -> (i32, i32) {
    %c0_i32 = arith.constant 0 : i32
    %c0_i32_0 = arith.constant 0 : i32
    %c0_i32_1 = arith.constant 0 : i32
    return %c0_i32, %c0_i32_0 : i32, i32
  }
  func.func @transform_2(%arg0: i32) -> (i32, i32, i32) {
    %c0_i32 = arith.constant 0 : i32
    %c0_i32_0 = arith.constant 0 : i32
    %c0_i32_1 = arith.constant 0 : i32
    return %arg0, %c0_i32, %c0_i32_0 : i32, i32, i32
  }
  func.func @transform_3(%arg0: i32) -> (i32, i32, i32) {
    %c0_i32 = arith.constant 0 : i32
    %c0_i32_0 = arith.constant 0 : i32
    %c0_i32_1 = arith.constant 0 : i32
    return %arg0, %c0_i32, %c0_i32_0 : i32, i32, i32
  }
  func.func @transform_4(%arg0: i32) -> (i32, i32, i32) {
    %c0_i32 = arith.constant 0 : i32
    %c0_i32_0 = arith.constant 0 : i32
    %c0_i32_1 = arith.constant 0 : i32
    return %arg0, %c0_i32, %c0_i32_0 : i32, i32, i32
  }
}

</mosaic_0001>

<bundles_post_ra>
// kernel: atd_forward.1
= control target key start
LH: loop header
LB: loop body
LE: loop exit
PB: predicated region body
PF: predicated region fallthrough
CT: control target
= control target key end

     0   :  { %s1411_s15 = smov 0   ;;  %s2153_s0 = inlined_call_operand.vmem [shape: f32[128,16], index: 0, kind: input, shape index: {}]   ;;  %s2154_s1 = inlined_call_operand.vmem [shape: f32[8,64], index: 1, kind: input, shape index: {}]   ;;  %s2155_s2 = inlined_call_operand.vmem [shape: f32[2,8,256], index: 2, kind: input, shape index: {}]   ;;  %s2156_s3 = inlined_call_operand.vmem [shape: f32[2,8,256], index: 3, kind: input, shape index: {}]   ;;  %s2157_s4 = inlined_call_operand.vmem [shape: f32[2,8,128], index: 4, kind: output, shape index: {}]  }
   0x1 LB: > { %s1200_s16 = sadd.s32 4294967295, %s1383_s15   ;;  %p1204_p0 = scmp.ge.s32.totalorder %s1383_s15, 1  ;;  %s1383_s15 = sphi %s1411_s15, %s14_s15  }
   0x2   : > { %p172_p1 = scmp.lt.s32.totalorder %s1383_s15, 3 }
   0x4   : > { %p173_p2 = pnand %p1204_p0, %p172_p1 }
   0x6   : > { %176 = sbr.rel (%p173_p2) target bundleno = 1326 (0x52e), region = 36 }
   0xb   : > { %p202_p3 = scmp.lt.s32.totalorder %s1200_s16, 1  ;;  %v220_v4 = vld [vmem:[%s2153_s0] sm:$0xff]  ;;  %vm237_vm0 = vcmask 130048   ;;  %v221_v5 = vld [vmem:[%s2153_s0 + $0x8] sm:$0xff]  ;;  %v222_v6 = vld [vmem:[%s2153_s0 + $0x10] sm:$0xff] }
   0xc   : > { %v223_v7 = vld [vmem:[%s2153_s0 + $0x18] sm:$0xff]  ;;  %v224_v8 = vld [vmem:[%s2153_s0 + $0x20] sm:$0xff]  ;;  %v225_v9 = vld [vmem:[%s2153_s0 + $0x28] sm:$0xff]  ;;  %s1385_s10 = smov 1e-12  }
   0xd   : > { %s2258_s16 = smov (!%p202_p3, %s1200_s16), 1  ;;  %v226_v10 = vld [vmem:[%s2153_s0 + $0x30] sm:$0xff]  ;;  %v227_v11 = vld [vmem:[%s2153_s0 + $0x38] sm:$0xff]  ;;  %v232_v38 = vld [vmem:[%s2153_s0 + $0x60] sm:$0xff] }
   0xe   : > { %s1248_s17 = sshll.u32 %s2258_s16, 4  ;;  %v230_v36 = vld [vmem:[%s2153_s0 + $0x50] sm:$0xff]  ;;  %v231_v37 = vld [vmem:[%s2153_s0 + $0x58] sm:$0xff]  ;;  %v233_v44 = vld [vmem:[%s2153_s0 + $0x68] sm:$0xff]  ;;  %s1209_s19 = sshll.u32 %s2258_s16, 3 }
   0xf   : > { %s1425_s20 = scalar_lea.vmem %s2156_s3, %s1248_s17  ;;  %s1430_s23 = scalar_lea.vmem %s2155_s2, %s1248_s17  ;;  %v234_v53 = vld [vmem:[%s2153_s0 + $0x70] sm:$0xff]  ;;  %v228_v54 = vld [vmem:[%s2153_s0 + $0x40] sm:$0xff]  ;;  %v235_v63 = vld [vmem:[%s2153_s0 + $0x78] sm:$0xff] }
  0x10   : > { %v218_v0 = vld [vmem:[%s1425_s20] sm:$0xff]  ;;  %v219_v1 = vld [vmem:[%s1425_s20 + $0x8] sm:$0xff]  ;;  %s215_s24 = scalar_lea.vmem %s2157_s4, %s1209_s19 }
  0x11   : > { %v216_v2 = vld [vmem:[%s1430_s23] sm:$0xff]  ;;  %300 = vmatpush.msra.mxu0 %v218_v0  ;;  %365 = vmatpush.msra.mxu1 %v219_v1  ;;  %v217_v3 = vld [vmem:[%s1430_s23 + $0x8] sm:$0xff] }
  0x12   : > { %1250 = vmatpush.msra.mxu2 %v218_v0  ;;  %1252 = vmatpush.msra.mxu3 %v219_v1  ;;  %v229_v0 = vld [vmem:[%s2153_s0 + $0x48] sm:$0xff] }
  0x13   : > { %301 = vmatpush.msra.mxu0 %v216_v2  ;;  %366 = vmatpush.msra.mxu1 %v217_v3 }
  0x14   : > { %1210 = vmatmul.msk.f32.vlgmr.msra.gmra.mxu0 %vm237_vm0, %v220_v4  ;;  %1226 = vmatmul.msk.f32.vlgmr.msra.gmra.mxu1 %vm237_vm0, %v220_v4 }
  0x15   : > { %1251 = vmatpush.msra.mxu2 %v216_v2  ;;  %1253 = vmatpush.msra.mxu3 %v217_v3 }
  0x16   : > { %1220 = vmatmul.msk.f32.vlgmr.msra.gmra.mxu2 %vm237_vm0, %v230_v36  ;;  %1236 = vmatmul.msk.f32.vlgmr.msra.gmra.mxu3 %vm237_vm0, %v230_v36 }
  0x1c   : > { %1211 = vmatmul.msk.f32.gmra.mxu0 %vm237_vm0, %v221_v5  ;;  %1227 = vmatmul.msk.f32.gmra.mxu1 %vm237_vm0, %v221_v5 }
  0x1e   : > { %1221 = vmatmul.msk.f32.gmra.mxu2 %vm237_vm0, %v231_v37  ;;  %1237 = vmatmul.msk.f32.gmra.mxu3 %vm237_vm0, %v231_v37 }
  0x24   : > { %1212 = vmatmul.msk.f32.gmra.mxu0 %vm237_vm0, %v222_v6  ;;  %1228 = vmatmul.msk.f32.gmra.mxu1 %vm237_vm0, %v222_v6 }
  0x26   : > { %1222 = vmatmul.msk.f32.gmra.mxu2 %vm237_vm0, %v232_v38  ;;  %1238 = vmatmul.msk.f32.gmra.mxu3 %vm237_vm0, %v232_v38 }
  0x2c   : > { %1213 = vmatmul.msk.f32.gmra.mxu0 %vm237_vm0, %v223_v7  ;;  %1229 = vmatmul.msk.f32.gmra.mxu1 %vm237_vm0, %v223_v7 }
  0x2e   : > { %1223 = vmatmul.msk.f32.gmra.mxu2 %vm237_vm0, %v233_v44  ;;  %1239 = vmatmul.msk.f32.gmra.mxu3 %vm237_vm0, %v233_v44 }
  0x34   : > { %1214 = vmatmul.msk.f32.gmra.mxu0 %vm237_vm0, %v224_v8  ;;  %1230 = vmatmul.msk.f32.gmra.mxu1 %vm237_vm0, %v224_v8 }
  0x36   : > { %1224 = vmatmul.msk.f32.gmra.mxu2 %vm237_vm0, %v234_v53  ;;  %1240 = vmatmul.msk.f32.gmra.mxu3 %vm237_vm0, %v234_v53 }
  0x3c   : > { %1215 = vmatmul.msk.f32.gmra.mxu0 %vm237_vm0, %v225_v9  ;;  %1231 = vmatmul.msk.f32.gmra.mxu1 %vm237_vm0, %v225_v9 }
  0x3e   : > { %1225 = vmatmul.msk.f32.gmra.mxu2 %vm237_vm0, %v235_v63  ;;  %1241 = vmatmul.msk.f32.gmra.mxu3 %vm237_vm0, %v235_v63 }
  0x44   : > { %1216 = vmatmul.msk.f32.gmra.mxu0 %vm237_vm0, %v226_v10  ;;  %1232 = vmatmul.msk.f32.gmra.mxu1 %vm237_vm0, %v226_v10 }
  0x4c   : > { %1217 = vmatmul.msk.f32.gmra.mxu0 %vm237_vm0, %v227_v11  ;;  %1233 = vmatmul.msk.f32.gmra.mxu1 %vm237_vm0, %v227_v11 }
  0x54   : > { %1218 = vmatmul.msk.f32.gmra.mxu0 %vm237_vm0, %v228_v54  ;;  %1234 = vmatmul.msk.f32.gmra.mxu1 %vm237_vm0, %v228_v54 }
  0x5c   : > { %1219 = vmatmul.msk.f32.gmra.mxu0 %vm237_vm0, %v229_v0  ;;  %1235 = vmatmul.msk.f32.gmra.mxu1 %vm237_vm0, %v229_v0 }
  0x91   : > { %v1476_v12 = vpop.f32.mrf.mxu0  ;;  %v1478_v13 = vpop.f32.mrf.mxu1 }
  0x92   : > { %2183 = vst [vmem:[#allocation2_spill] sm:$0xff] %v1476_v12  ;;  %v416_v14 = vmax.f32 %v1476_v12, %v1478_v13 }
  0x93   : > { %2184 = vst [vmem:[#allocation3_spill] sm:$0xff] %v1478_v13 }
  0x94   : > { %417 = vmax.xlane.f32.xlu0 %v416_v14 }
  0x99   : > { %v1482_v15 = vpop.f32.mrf.mxu0  ;;  %v1484_v16 = vpop.f32.mrf.mxu1 }
  0x9a   : > { %2185 = vst [vmem:[#allocation4_spill] sm:$0xff] %v1482_v15  ;;  %v419_v17 = vmax.f32 %v1482_v15, %v1484_v16  ;;  %v1628_v0 = vpop.f32.mrf.mxu2 }
  0x9b   : > { %2186 = vst [vmem:[#allocation5_spill] sm:$0xff] %v1484_v16 }
  0x9c   : > { %420 = vmax.xlane.f32.xlu0 %v419_v17  ;;  %2193 = vst [vmem:[#allocation12_spill] sm:$0xff] %v1628_v0 }
  0xa1   : > { %v1488_v18 = vpop.f32.mrf.mxu0  ;;  %v1490_v19 = vpop.f32.mrf.mxu1 }
  0xa2   : > { %2187 = vst [vmem:[#allocation6_spill] sm:$0xff] %v1488_v18  ;;  %v422_v20 = vmax.f32 %v1488_v18, %v1490_v19 }
  0xa3   : > { %2188 = vst [vmem:[#allocation7_spill] sm:$0xff] %v1490_v19 }
  0xa4   : > { %423 = vmax.xlane.f32.xlu1 %v422_v20 }
  0xa9   : > { %v1494_v21 = vpop.f32.mrf.mxu0  ;;  %v1496_v22 = vpop.f32.mrf.mxu1 }
  0xaa   : > { %2189 = vst [vmem:[#allocation8_spill] sm:$0xff] %v1494_v21  ;;  %v425_v23 = vmax.f32 %v1494_v21, %v1496_v22 }
  0xab   : > { %2190 = vst [vmem:[#allocation9_spill] sm:$0xff] %v1496_v22 }
  0xac   : > { %426 = vmax.xlane.f32.xlu1 %v425_v23 }
  0xb1   : > { %v1500_v24 = vpop.f32.mrf.mxu0  ;;  %v1502_v25 = vpop.f32.mrf.mxu1 }
  0xb2   : > { %2191 = vst [vmem:[#allocation10_spill] sm:$0xff] %v1500_v24  ;;  %v428_v26 = vmax.f32 %v1500_v24, %v1502_v25 }
  0xb3   : > { %2192 = vst [vmem:[#allocation11_spill] sm:$0xff] %v1502_v25 }
  0xb4   : > { %429 = vmax.xlane.f32.xlu2 %v428_v26 }
  0xb9   : > { %v1506_v27 = vpop.f32.mrf.mxu0  ;;  %v1508_v28 = vpop.f32.mrf.mxu1 }
  0xba   : > { %v431_v29 = vmax.f32 %v1506_v27, %v1508_v28 }
  0xbc   : > { %432 = vmax.xlane.f32.xlu2 %v431_v29 }
  0xc1   : > { %v1512_v30 = vpop.f32.mrf.mxu0  ;;  %v1514_v31 = vpop.f32.mrf.mxu1 }
  0xc2   : > { %v434_v32 = vmax.f32 %v1512_v30, %v1514_v31 }
  0xc4   : > { %435 = vmax.xlane.f32.xlu0 %v434_v32 }
  0xc9   : > { %v1518_v33 = vpop.f32.mrf.mxu0  ;;  %v1520_v34 = vpop.f32.mrf.mxu1 }
  0xca   : > { %v437_v35 = vmax.f32 %v1518_v33, %v1520_v34 }
  0xcc   : > { %438 = vmax.xlane.f32.xlu1 %v437_v35 }
 0x107   : > { %v418_v39 = vpop.xlane.xlu0 %417 }
 0x108   : > { %v440_v40 = vsub.f32 %v1476_v12, %v418_v39  ;;  %v441_v41 = vsub.f32 %v1478_v13, %v418_v39 }
 0x10a   : > { %v456_v42 = vmul.f32 1.442695, %v440_v40  ;;  %v458_v43 = vmul.f32 1.442695, %v441_v41 }
 0x10c   : > { %1277 = vpow2.f32 %v456_v42 }
 0x10d   : > { %1279 = vpow2.f32 %v458_v43 }
 0x10f   : > { %v421_v45 = vpop.xlane.xlu0 %420 }
 0x110   : > { %v442_v46 = vsub.f32 %v1482_v15, %v421_v45  ;;  %v443_v47 = vsub.f32 %v1484_v16, %v421_v45 }
 0x112   : > { %v1548_v48 = vpop.eup %1277  ;;  %v460_v49 = vmul.f32 1.442695, %v442_v46  ;;  %v462_v50 = vmul.f32 1.442695, %v443_v47 }
 0x113   : > { %v1550_v51 = vpop.eup %1279 }
 0x114   : > { %1281 = vpow2.f32 %v460_v49  ;;  %v488_v52 = vadd.f32 %v1550_v51, %v1548_v48 }
 0x115   : > { %1283 = vpow2.f32 %v462_v50 }
 0x116   : > { %489 = vadd.xlane.f32.xlu2 %v488_v52 }
 0x117   : > { %v424_v55 = vpop.xlane.xlu1 %423 }
 0x118   : > { %v444_v56 = vsub.f32 %v1488_v18, %v424_v55  ;;  %v445_v57 = vsub.f32 %v1490_v19, %v424_v55 }
 0x11a   : > { %v1566_v58 = vpop.eup %1281  ;;  %v464_v59 = vmul.f32 1.442695, %v444_v56  ;;  %v466_v60 = vmul.f32 1.442695, %v445_v57 }
 0x11b   : > { %v1568_v61 = vpop.eup %1283 }
 0x11c   : > { %1285 = vpow2.f32 %v464_v59  ;;  %v491_v62 = vadd.f32 %v1568_v61, %v1566_v58 }
 0x11d   : > { %1287 = vpow2.f32 %v466_v60 }
 0x11e   : > { %492 = vadd.xlane.f32.xlu0 %v491_v62 }
 0x11f   : > { %v427_v1 = vpop.xlane.xlu1 %426 }
 0x120   : > { %v446_v2 = vsub.f32 %v1494_v21, %v427_v1  ;;  %v447_v3 = vsub.f32 %v1496_v22, %v427_v1  ;;  %v1630_v1 = vpop.f32.mrf.mxu3 }
 0x121   : > { %2194 = vst [vmem:[#allocation13_spill] sm:$0xff] %v1630_v1 }
 0x122   : > { %v1584_v4 = vpop.eup %1285  ;;  %v468_v5 = vmul.f32 1.442695, %v446_v2  ;;  %v470_v6 = vmul.f32 1.442695, %v447_v3  ;;  %v1632_v2 = vpop.f32.mrf.mxu2 }
 0x123   : > { %v1586_v7 = vpop.eup %1287  ;;  %2195 = vst [vmem:[#allocation14_spill] sm:$0xff] %v1632_v2 }
 0x124   : > { %1289 = vpow2.f32 %v468_v5  ;;  %v494_v8 = vadd.f32 %v1586_v7, %v1584_v4 }
 0x125   : > { %1291 = vpow2.f32 %v470_v6 }
 0x126   : > { %495 = vadd.xlane.f32.xlu1 %v494_v8 }
 0x127   : > { %v430_v9 = vpop.xlane.xlu2 %429 }
 0x128   : > { %v448_v10 = vsub.f32 %v1500_v24, %v430_v9  ;;  %v449_v11 = vsub.f32 %v1502_v25, %v430_v9  ;;  %v1634_v3 = vpop.f32.mrf.mxu3 }
 0x129   : > { %2196 = vst [vmem:[#allocation15_spill] sm:$0xff] %v1634_v3 }
 0x12a   : > { %v1592_v14 = vpop.eup %1289  ;;  %v472_v17 = vmul.f32 1.442695, %v448_v10  ;;  %v474_v20 = vmul.f32 1.442695, %v449_v11  ;;  %v1636_v5 = vpop.f32.mrf.mxu2 }
 0x12b   : > { %v1594_v23 = vpop.eup %1291 }
 0x12c   : > { %1293 = vpow2.f32 %v472_v17  ;;  %v497_v26 = vadd.f32 %v1594_v23, %v1592_v14  ;;  %v1647_v17 = vpop.f32.mrf.mxu0 }
 0x12d   : > { %1295 = vpow2.f32 %v474_v20  ;;  %2198 = vst [vmem:[#allocation17_spill] sm:$0xff] %v1647_v17  ;;  %v1649_v20 = vpop.f32.mrf.mxu1 }
 0x12e   : > { %498 = vadd.xlane.f32.xlu2 %v497_v26  ;;  %2199 = vst [vmem:[#allocation18_spill] sm:$0xff] %v1649_v20 }
 0x12f   : > { %v433_v29 = vpop.xlane.xlu2 %432 }
 0x130   : > { %v450_v32 = vsub.f32 %v1506_v27, %v433_v29  ;;  %v451_v35 = vsub.f32 %v1508_v28, %v433_v29  ;;  %v1638_v6 = vpop.f32.mrf.mxu3 }
 0x131   : > { %2197 = vst [vmem:[#allocation16_spill] sm:$0xff] %v1638_v6 }
 0x132   : > { %v1600_v36 = vpop.eup %1293  ;;  %v476_v37 = vmul.f32 1.442695, %v450_v32  ;;  %v478_v38 = vmul.f32 1.442695, %v451_v35  ;;  %v1642_v10 = vpop.f32.mrf.mxu2 }
 0x133   : > { %v1602_v39 = vpop.eup %1295 }
 0x134   : > { %1297 = vpow2.f32 %v476_v37  ;;  %v500_v40 = vadd.f32 %v1602_v39, %v1600_v36 }
 0x135   : > { %1299 = vpow2.f32 %v478_v38 }
 0x136   : > { %501 = vadd.xlane.f32.xlu0 %v500_v40 }
 0x137   : > { %v436_v41 = vpop.xlane.xlu0 %435 }
 0x138   : > { %v452_v42 = vsub.f32 %v1512_v30, %v436_v41  ;;  %v453_v43 = vsub.f32 %v1514_v31, %v436_v41  ;;  %v1645_v11 = vpop.f32.mrf.mxu3 }
 0x13a   : > { %v1608_v44 = vpop.eup %1297  ;;  %v480_v45 = vmul.f32 1.442695, %v452_v42  ;;  %v482_v46 = vmul.f32 1.442695, %v453_v43  ;;  %v1660_v38 = vpop.f32.mrf.mxu2 }
 0x13b   : > { %v1610_v47 = vpop.eup %1299  ;;  %v1665_v43 = vpop.f32.mrf.mxu0 }
 0x13c   : > { %1301 = vpow2.f32 %v480_v45  ;;  %v503_v49 = vadd.f32 %v1610_v47, %v1608_v44  ;;  %2200 = vst [vmem:[#allocation19_spill] sm:$0xff] %v1665_v43  ;;  %v1667_v45 = vpop.f32.mrf.mxu1 }
 0x13d   : > { %1303 = vpow2.f32 %v482_v46  ;;  %2201 = vst [vmem:[#allocation20_spill] sm:$0xff] %v1667_v45  ;;  %v738_v46 = vmax.f32 %v1647_v17, %v1628_v0 }
 0x13e   : > { %504 = vadd.xlane.f32.xlu1 %v503_v49  ;;  %v751_v49 = vmax.f32 %v1649_v20, %v1630_v1 }
 0x13f   : > { %v439_v50 = vpop.xlane.xlu1 %438 }
 0x140   : > { %v454_v52 = vsub.f32 %v1518_v33, %v439_v50  ;;  %v455_v53 = vsub.f32 %v1520_v34, %v439_v50  ;;  %v1663_v40 = vpop.f32.mrf.mxu3  ;;  %v739_v50 = vmax.f32 %v1665_v43, %v1632_v2 }
 0x142   : > { %v1616_v54 = vpop.eup %1301  ;;  %v484_v55 = vmul.f32 1.442695, %v454_v52  ;;  %v486_v56 = vmul.f32 1.442695, %v455_v53  ;;  %v752_v52 = vmax.f32 %v1667_v45, %v1634_v3  ;;  %v1687_v13 = vpop.f32.mrf.mxu2 }
 0x143   : > { %v1618_v57 = vpop.eup %1303 }
 0x144   : > { %1305 = vpow2.f32 %v484_v55  ;;  %v506_v59 = vadd.f32 %v1618_v57, %v1616_v54  ;;  %v740_v55 = vmax.f32 %v738_v46, %v1636_v5  ;;  %v754_v16 = vmax.f32 %v752_v52, %v1645_v11 }
 0x145   : > { %1307 = vpow2.f32 %v486_v56  ;;  %v753_v56 = vmax.f32 %v751_v49, %v1638_v6 }
 0x146   : > { %507 = vadd.xlane.f32.xlu2 %v506_v59  ;;  %v741_v59 = vmax.f32 %v739_v50, %v1642_v10  ;;  %v742_v50 = vmax.f32 %v740_v55, %v1660_v38 }
 0x148   : > { %v1692_v15 = vpop.f32.mrf.mxu3  ;;  %v743_v19 = vmax.f32 %v741_v59, %v1687_v13 }
 0x149   : > { %v756_v21 = vmax.f32 %v754_v16, %v1692_v15 }
 0x14a   : > { %v1622_v60 = vpop.eup %1305 }
 0x14b   : > { %v1624_v62 = vpop.eup %1307 }
 0x14c   : > { %v509_v63 = vadd.f32 %v1624_v62, %v1622_v60 }
 0x14e   : > { %510 = vadd.xlane.f32.xlu0 %v509_v63 }
 0x189   : > { %v490_v8 = vpop.xlane.xlu2 %489 }
 0x18a   : > { %1309 = vrcp.f32 %v490_v8  ;;  %v521_v49 = vand.u32 2147483647, %v490_v8  ;;  %v523_v22 = vand.u32 2147483648, %v490_v8  ;;  %vm517_vm3 = vweird.f32 %v490_v8 }
 0x18c   : > { %vm1713_vm6 = vcmp.eq.f32.partialorder %v521_v49, 8.507059e+37 }
 0x190   : > { %v1651_v26 = vpop.eup %1309 }
 0x191   : > { %v1640_v9 = vpop.xlane.xlu0 %492  ;;  %v513_v32 = vmul.f32 %v1651_v26, %v490_v8  ;;  %vm518_vm1 = vweird.f32 %v1651_v26 }
 0x192   : > { %1311 = vrcp.f32 %v1640_v9  ;;  %v536_v55 = vand.u32 2147483647, %v1640_v9  ;;  %vm1705_vm4 = vmor %vm517_vm3, %vm518_vm1  ;;  %vm532_vm5 = vweird.f32 %v1640_v9 }
 0x193   : > { %v514_v41 = vsub.f32 1.0, %v513_v32 }
 0x194   : > { %vm537_vm9 = vcmp.eq.f32.partialorder %v536_v55, 8.507059e+37 }
 0x195   : > { %v515_v63 = vmul.f32 %v1651_v26, %v514_v41  ;;  %v755_v41 = vmax.f32 %v753_v56, %v1663_v40  ;;  %v538_v56 = vand.u32 2147483648, %v1640_v9 }
 0x197   : > { %v516_v18 = vadd.f32 %v1651_v26, %v515_v63  ;;  %v757_v24 = vmax.f32 %v755_v41, %v756_v21 }
 0x198   : > { %v1653_v29 = vpop.eup %1311 }
 0x199   : > { %v528_v35 = vmul.f32 %v1653_v29, %v1640_v9  ;;  %v1658_v37 = vpop.xlane.xlu1 %495  ;;  %vm533_vm2 = vweird.f32 %v1653_v29  ;;  %v758_v63 = vrot.slane %v757_v24, 4 }
 0x19a   : > { %1313 = vrcp.f32 %v1658_v37  ;;  %vm1719_vm7 = vmor %vm532_vm5, %vm533_vm2  ;;  %vm547_vm10 = vweird.f32 %v1658_v37 }
 0x19b   : > { %v529_v42 = vsub.f32 1.0, %v528_v35 }
 0x19d   : > { %v530_v12 = vmul.f32 %v1653_v29, %v529_v42 }
 0x19f   : > { %v531_v42 = vadd.f32 %v1653_v29, %v530_v12  ;;  %v520_v12 = vsel %vm1705_vm4, %v1651_v26, %v516_v18  ;;  %v553_v26 = vand.u32 2147483648, %v1658_v37 }
 0x1a0   : > { %v1677_v53 = vpop.eup %1313 }
 0x1a1   : > { %v543_v32 = vmul.f32 %v1677_v53, %v1658_v37  ;;  %v1685_v35 = vpop.xlane.xlu2 %498  ;;  %v535_v21 = vsel %vm1719_vm7, %v1653_v29, %v531_v42  ;;  %vm548_vm8 = vweird.f32 %v1677_v53 }
 0x1a2   : > { %1315 = vrcp.f32 %v1685_v35  ;;  %vm1737_vm11 = vmor %vm547_vm10, %vm548_vm8  ;;  %vm562_vm13 = vweird.f32 %v1685_v35 }
 0x1a3   : > { %v544_v46 = vsub.f32 1.0, %v543_v32  ;;  %v744_v32 = vmax.f32 %v742_v50, %v743_v19  ;;  %v524_v19 = vor.u32 1.1754944e-38, %v523_v22  ;;  %v539_v22 = vor.u32 1.1754944e-38, %v538_v56 }
 0x1a4   : > { %v551_v50 = vand.u32 2147483647, %v1658_v37  ;;  %v568_v56 = vand.u32 2147483648, %v1685_v35  ;;  %v759_v37 = vmax.f32 %v757_v24, %v758_v63 }
 0x1a5   : > { %v545_v52 = vmul.f32 %v1677_v53, %v544_v46  ;;  %v745_v25 = vrot.slane %v744_v32, 4  ;;  %v525_v29 = vsel %vm1713_vm6, %v524_v19, %v520_v12  ;;  %v540_v42 = vsel %vm537_vm9, %v539_v22, %v535_v21 }
 0x1a6   : > { %v566_v12 = vand.u32 2147483647, %v1685_v35  ;;  %v1748_v19 = vmul.f32 %v1566_v58, %v540_v42  ;;  %vm552_vm14 = vcmp.eq.f32.partialorder %v551_v50, 8.507059e+37  ;;  %v1763_v58 = vmul.f32 %v1548_v48, %v525_v29 }
 0x1a7   : > { %v546_v18 = vadd.f32 %v1677_v53, %v545_v52  ;;  %v746_v41 = vmax.f32 %v744_v32, %v745_v25  ;;  %v554_v25 = vor.u32 1.1754944e-38, %v553_v26  ;;  %v760_v50 = vrot.slane %v759_v37, 2 }
 0x1a8   : > { %v1316_v59 = vpop.eup %1315  ;;  %vm567_vm0 = vcmp.eq.f32.partialorder %v566_v12, 8.507059e+37 }
 0x1a9   : > { %v558_v46 = vmul.f32 %v1316_v59, %v1685_v35  ;;  %v1724_v9 = vpop.xlane.xlu0 %501  ;;  %vm563_vm12 = vweird.f32 %v1316_v59  ;;  %v550_v55 = vsel %vm1737_vm11, %v1677_v53, %v546_v18  ;;  %v1755_v18 = vmul.f32 %v1568_v61, %v540_v42 }
 0x1aa   : > { %1317 = vrcp.f32 %v1724_v9  ;;  %vm1750_vm15 = vmor %vm562_vm13, %vm563_vm12  ;;  %v555_v24 = vsel %vm552_vm14, %v554_v25, %v550_v55  ;;  %v581_v63 = vand.u32 2147483647, %v1724_v9  ;;  %vm577_vm1 = vweird.f32 %v1724_v9 }
 0x1ab   : > { %v559_v49 = vsub.f32 1.0, %v558_v46  ;;  %v747_v46 = vrot.slane %v746_v41, 2  ;;  %v1774_v42 = vmul.f32 %v1586_v7, %v555_v24 }
 0x1ac   : > { %vm1790_vm3 = vcmp.eq.f32.partialorder %v581_v63, 8.507059e+37 }
 0x1ad   : > { %v560_v8 = vmul.f32 %v1316_v59, %v559_v49  ;;  %v748_v53 = vmax.f32 %v746_v41, %v747_v46  ;;  %v569_v49 = vor.u32 1.1754944e-38, %v568_v56  ;;  %v1767_v41 = vmul.f32 %v1550_v51, %v525_v29 }
 0x1ae   : > { %v583_v29 = vand.u32 2147483648, %v1724_v9 }
 0x1af   : > { %v561_v32 = vadd.f32 %v1316_v59, %v560_v8  ;;  %v749_v48 = vrot.slane %v748_v53, 1  ;;  %v648_v8 = vadd.f32 %v1748_v19, %v1763_v58  ;;  %v661_v55 = vadd.f32 %v1755_v18, %v1767_v41 }
 0x1b0   : > { %v1318_v16 = vpop.eup %1317 }
 0x1b1   : > { %v565_v22 = vsel %vm1750_vm15, %v1316_v59, %v561_v32  ;;  %v573_v26 = vmul.f32 %v1318_v16, %v1724_v9  ;;  %v1760_v35 = vpop.xlane.xlu1 %504  ;;  %v1771_v59 = vmul.f32 %v1584_v4, %v555_v24  ;;  %vm578_vm2 = vweird.f32 %v1318_v16 }
 0x1b2   : > { %1319 = vrcp.f32 %v1760_v35  ;;  %v570_v52 = vsel %vm567_vm0, %v569_v49, %v565_v22  ;;  %v1782_v56 = vmax.f32 %v748_v53, %v749_v48  ;;  %v761_v4 = vmax.f32 %v759_v37, %v760_v50  ;;  %vm1800_vm4 = vmor %vm577_vm1, %vm578_vm2 }
 0x1b3   : > { %v574_v61 = vsub.f32 1.0, %v573_v26  ;;  %v1785_v7 = vmul.f32 %v1592_v14, %v570_v52  ;;  %v1788_v46 = vmul.f32 %v1594_v23, %v570_v52  ;;  %v649_v21 = vadd.f32 %v648_v8, %v1771_v59 }
 0x1b4   : > { %v662_v9 = vadd.f32 %v661_v55, %v1774_v42  ;;  %v596_v53 = vand.u32 2147483647, %v1760_v35  ;;  %v598_v37 = vand.u32 2147483648, %v1760_v35  ;;  %v584_v23 = vor.u32 1.1754944e-38, %v583_v29 }
 0x1b5   : > { %v575_v51 = vmul.f32 %v1318_v16, %v574_v61  ;;  %v764_v26 = vsub.f32 %v1647_v17, %v1782_v56  ;;  %v766_v49 = vsub.f32 %v1665_v43, %v1782_v56  ;;  %v768_v61 = vsub.f32 %v1628_v0, %v1782_v56 }
 0x1b6   : > { %v762_v63 = vrot.slane %v761_v4, 1  ;;  %v1818_v52 = vadd.f32 %v649_v21, %v1785_v7  ;;  %v1821_v48 = vadd.f32 %v662_v9, %v1788_v46  ;;  %vm592_vm5 = vweird.f32 %v1760_v35 }
 0x1b7   : > { %v576_v25 = vadd.f32 %v1318_v16, %v575_v51  ;;  %vm1825_vm7 = vcmp.eq.f32.partialorder %v596_v53, 8.507059e+37  ;;  %v770_v51 = vsub.f32 %v1632_v2, %v1782_v56  ;;  %v772_v29 = vsub.f32 %v1636_v5, %v1782_v56 }
 0x1b8   : > { %v1794_v12 = vpop.eup %1319  ;;  %v780_v9 = vmul.f32 1.442695, %v764_v26  ;;  %v784_v14 = vmul.f32 1.442695, %v766_v49  ;;  %v774_v53 = vsub.f32 %v1642_v10, %v1782_v56  ;;  %v788_v17 = vmul.f32 1.442695, %v768_v61 }
 0x1b9   : > { %v588_v24 = vmul.f32 %v1794_v12, %v1760_v35  ;;  %v1806_v22 = vpop.xlane.xlu2 %507  ;;  %v580_v50 = vsel %vm1800_vm4, %v1318_v16, %v576_v25  ;;  %vm593_vm6 = vweird.f32 %v1794_v12  ;;  %v599_v16 = vor.u32 1.1754944e-38, %v598_v37 }
 0x1ba   : > { %1321 = vrcp.f32 %v1806_v22  ;;  %v585_v25 = vsel %vm1790_vm3, %v584_v23, %v580_v50  ;;  %v1839_v37 = vmax.f32 %v761_v4, %v762_v63  ;;  %vm607_vm8 = vweird.f32 %v1806_v22  ;;  %vm1858_vm9 = vmor %vm592_vm5, %vm593_vm6 }
 0x1bb   : > { %v589_v8 = vsub.f32 1.0, %v588_v24  ;;  %v611_v24 = vand.u32 2147483647, %v1806_v22  ;;  %v613_v0 = vand.u32 2147483648, %v1806_v22  ;;  %v776_v32 = vsub.f32 %v1660_v38, %v1782_v56 }
 0x1bc   : > { %1323 = vpow2.f32 %v780_v9  ;;  %v1847_v26 = vmul.f32 %v1600_v36, %v585_v25  ;;  %v778_v49 = vsub.f32 %v1687_v13, %v1782_v56  ;;  %v792_v4 = vmul.f32 1.442695, %v770_v51 }
 0x1bd   : > { %v590_v21 = vmul.f32 %v1794_v12, %v589_v8  ;;  %1325 = vpow2.f32 %v784_v14  ;;  %v1852_v50 = vmul.f32 %v1602_v39, %v585_v25  ;;  %v796_v8 = vmul.f32 1.442695, %v772_v29 }
 0x1be   : > { %1327 = vpow2.f32 %v788_v17  ;;  %vm1868_vm10 = vcmp.eq.f32.partialorder %v611_v24, 8.507059e+37  ;;  %v800_v35 = vmul.f32 1.442695, %v774_v53  ;;  %v765_v51 = vsub.f32 %v1649_v20, %v1839_v37 }
 0x1bf   : > { %v591_v43 = vadd.f32 %v1794_v12, %v590_v21  ;;  %v614_v21 = vor.u32 1.1754944e-38, %v613_v0  ;;  %v804_v9 = vmul.f32 1.442695, %v776_v32  ;;  %v767_v17 = vsub.f32 %v1667_v45, %v1839_v37 }
 0x1c0   : > { %v1322_v23 = vpop.eup %1321  ;;  %v808_v29 = vmul.f32 1.442695, %v778_v49  ;;  %v771_v0 = vsub.f32 %v1634_v3, %v1839_v37  ;;  %v773_v49 = vsub.f32 %v1638_v6, %v1839_v37 }
 0x1c1   : > { %v603_v63 = vmul.f32 %v1322_v23, %v1806_v22  ;;  %v1863_v36 = vpop.xlane.xlu0 %510  ;;  %v595_v56 = vsel %vm1858_vm9, %v1794_v12, %v591_v43  ;;  %vm608_vm11 = vweird.f32 %v1322_v23  ;;  %v769_v43 = vsub.f32 %v1630_v1, %v1839_v37 }
 0x1c2   : > { %1329 = vrcp.f32 %v1863_v36  ;;  %v1879_v12 = vpop.eup %1323  ;;  %v600_v14 = vsel %vm1825_vm7, %v599_v16, %v595_v56  ;;  %v626_v32 = vand.u32 2147483647, %v1863_v36  ;;  %vm622_vm12 = vweird.f32 %v1863_v36  ;;  %vm609_vm13 = vmor %vm607_vm8, %vm608_vm11 }
 0x1c3   : > { %v604_v25 = vsub.f32 1.0, %v603_v63  ;;  %1331 = vpow2.f32 %v792_v4  ;;  %2222 = vst [vmem:[#allocation21_spill] sm:$0xff] %v1879_v12  ;;  %v1885_v53 = vpop.eup %1325  ;;  %v782_v4 = vmul.f32 1.442695, %v765_v51  ;;  %v786_v16 = vmul.f32 1.442695, %v767_v17 }
 0x1c4   : > { %1333 = vpow2.f32 %v796_v8  ;;  %2223 = vst [vmem:[#allocation22_spill] sm:$0xff] %v1885_v53  ;;  %v1890_v61 = vpop.eup %1327  ;;  %v812_v55 = vadd.f32 %v1885_v53, %v1879_v12  ;;  %v1896_v56 = vmul.f32 %v1608_v44, %v600_v14  ;;  %v790_v51 = vmul.f32 1.442695, %v769_v43 }
 0x1c5   : > { %v605_v24 = vmul.f32 %v1322_v23, %v604_v25  ;;  %1335 = vpow2.f32 %v800_v35  ;;  %2224 = vst [vmem:[#allocation23_spill] sm:$0xff] %v1890_v61  ;;  %v775_v35 = vsub.f32 %v1645_v11, %v1839_v37  ;;  %v794_v20 = vmul.f32 1.442695, %v771_v0 }
 0x1c6   : > { %1337 = vpow2.f32 %v804_v9  ;;  %v1908_v44 = vmul.f32 %v1610_v47, %v600_v14  ;;  %v777_v22 = vsub.f32 %v1663_v40, %v1839_v37  ;;  %v628_v47 = vand.u32 2147483648, %v1863_v36 }
 0x1c7   : > { %v606_v63 = vadd.f32 %v1322_v23, %v605_v24  ;;  %1339 = vpow2.f32 %v808_v29  ;;  %v813_v24 = vadd.f32 %v1890_v61, %v812_v55  ;;  %v798_v29 = vmul.f32 1.442695, %v773_v49 }
 0x1c8   : > { %v1330_v8 = vpop.eup %1329  ;;  %1341 = vpow2.f32 %v782_v4  ;;  %v779_v14 = vsub.f32 %v1692_v15, %v1839_v37  ;;  %v802_v39 = vmul.f32 1.442695, %v775_v35  ;;  %vm627_vm0 = vcmp.eq.f32.partialorder %v626_v32, 8.507059e+37 }
 0x1c9   : > { %v610_v25 = vsel %vm609_vm13, %v1322_v23, %v606_v63  ;;  %v618_v9 = vmul.f32 %v1330_v8, %v1863_v36  ;;  %v1905_v17 = vpop.eup %1331  ;;  %1343 = vpow2.f32 %v786_v16  ;;  %vm623_vm14 = vweird.f32 %v1330_v8 }
 0x1ca   : > { %v1912_v45 = vpop.eup %1333  ;;  %v615_v23 = vsel %vm1868_vm10, %v614_v21, %v610_v25  ;;  %v814_v63 = vadd.f32 %v1905_v17, %v813_v24  ;;  %1345 = vpow2.f32 %v790_v51  ;;  %v806_v25 = vmul.f32 1.442695, %v777_v22  ;;  %vm624_vm15 = vmor %vm622_vm12, %vm623_vm14 }
 0x1cb   : > { %v619_v43 = vsub.f32 1.0, %v618_v9  ;;  %v1917_v0 = vpop.eup %1335  ;;  %1347 = vpow2.f32 %v794_v20  ;;  %v1928_v16 = vmul.f32 %v1616_v54, %v615_v23  ;;  %v651_v9 = vadd.f32 %v1818_v52, %v1847_v26 }
 0x1cc   : > { %v1922_v4 = vpop.eup %1337  ;;  %v815_v55 = vadd.f32 %v1912_v45, %v814_v63  ;;  %v1933_v24 = vmul.f32 %v1618_v57, %v615_v23  ;;  %1349 = vpow2.f32 %v798_v29  ;;  %v664_v20 = vadd.f32 %v1821_v48, %v1852_v50 }
 0x1cd   : > { %v620_v49 = vmul.f32 %v1330_v8, %v619_v43  ;;  %v1925_v21 = vpop.eup %1339  ;;  %v629_v54 = vor.u32 1.1754944e-38, %v628_v47  ;;  %v810_v22 = vmul.f32 1.442695, %v779_v14  ;;  %v652_v52 = vadd.f32 %v651_v9, %v1896_v56 }
 0x1ce   : > { %v816_v51 = vadd.f32 %v1917_v0, %v815_v55  ;;  %v1938_v35 = vpop.eup %1341  ;;  %1351 = vpow2.f32 %v802_v39  ;;  %v665_v43 = vadd.f32 %v664_v20, %v1908_v44 }
 0x1cf   : > { %v621_v37 = vadd.f32 %v1330_v8, %v620_v49  ;;  %2225 = vst [vmem:[#allocation24_spill] sm:$0xff] %v1938_v35  ;;  %v1944_v57 = vpop.eup %1343  ;;  %1353 = vpow2.f32 %v806_v25  ;;  %v653_v47 = vadd.f32 %v652_v52, %v1928_v16 }
 0x1d0   : > { %2226 = vst [vmem:[#allocation25_spill] sm:$0xff] %v1944_v57  ;;  %v817_v23 = vadd.f32 %v1922_v4, %v816_v51  ;;  %v1948_v48 = vpop.eup %1345  ;;  %v825_v36 = vadd.f32 %v1944_v57, %v1938_v35  ;;  %1355 = vpow2.f32 %v810_v22 }
 0x1d1   : > { %v625_v29 = vsel %vm624_vm15, %v1330_v8, %v621_v37  ;;  %2227 = vst [vmem:[#allocation26_spill] sm:$0xff] %v1948_v48  ;;  %v1953_v32 = vpop.eup %1347  ;;  %v666_v8 = vadd.f32 %v665_v43, %v1933_v24 }
 0x1d2   : > { %v630_v63 = vsel %vm627_vm0, %v629_v54, %v625_v29  ;;  %v818_v14 = vadd.f32 %v1925_v21, %v817_v23  ;;  %v826_v39 = vadd.f32 %v1948_v48, %v825_v36  ;;  %v1960_v9 = vpop.eup %1349 }
 0x1d3   : > { %v646_v49 = vmul.f32 %v1622_v60, %v630_v63  ;;  %v647_v55 = vmul.f32 %v1624_v62, %v630_v63 }
 0x1d4   : > { %v819_v25 = vrot.slane %v818_v14, 4  ;;  %v827_v20 = vadd.f32 %v1953_v32, %v826_v39  ;;  %v1963_v54 = vpop.eup %1351 }
 0x1d5   : > { %v654_v37 = vadd.f32 %v653_v47, %v646_v49  ;;  %v667_v51 = vadd.f32 %v666_v8, %v647_v55  ;;  %v1965_v60 = vpop.eup %1353 }
 0x1d6   : > { %v820_v52 = vadd.f32 %v819_v25, %v818_v14  ;;  %v828_v62 = vadd.f32 %v1960_v9, %v827_v20  ;;  %v1969_v1 = vpop.eup %1355 }
 0x1d7   : > { %v655_v23 = vrot.slane %v654_v37, 4  ;;  %v668_v29 = vrot.slane %v667_v51, 4 }
 0x1d8   : > { %v821_v43 = vrot.slane %v820_v52, 2  ;;  %v829_v35 = vadd.f32 %v1963_v54, %v828_v62 }
 0x1d9   : > { %v656_v63 = vadd.f32 %v655_v23, %v654_v37  ;;  %v669_v36 = vadd.f32 %v668_v29, %v667_v51 }
 0x1da   : > { %v822_v22 = vadd.f32 %v821_v43, %v820_v52  ;;  %v830_v39 = vadd.f32 %v1965_v60, %v829_v35 }
 0x1db   : > { %v657_v47 = vrot.slane %v656_v63, 2  ;;  %v670_v8 = vrot.slane %v669_v36, 2 }
 0x1dc   : > { %v823_v12 = vrot.slane %v822_v22, 1  ;;  %v831_v57 = vadd.f32 %v1969_v1, %v830_v39  ;;  %v721_v39 = vmul.f32 %v647_v55, %v1520_v34 }
 0x1dd   : > { %v658_v14 = vadd.f32 %v657_v47, %v656_v63  ;;  %v671_v25 = vadd.f32 %v670_v8, %v669_v36 }
 0x1de   : > { %v1973_v3 = vadd.f32 %v823_v12, %v822_v22  ;;  %v832_v37 = vrot.slane %v831_v57, 4 }
 0x1df   : > { %v659_v20 = vrot.slane %v658_v14, 1  ;;  %v672_v53 = vrot.slane %v671_v25, 1 }
 0x1e0   : > { %1357 = vrcp.f32 %v1973_v3  ;;  %v833_v51 = vadd.f32 %v832_v37, %v831_v57  ;;  %vm843_vm1 = vweird.f32 %v1973_v3 }
 0x1e1   : > { %v660_v23 = vadd.f32 %v659_v20, %v658_v14  ;;  %v673_v29 = vadd.f32 %v672_v53, %v671_v25  ;;  %v720_v53 = vmul.f32 %v646_v49, %v1518_v33  ;;  %v718_v14 = vmul.f32 %v1928_v16, %v1512_v30 }
 0x1e2   : > { %v834_v52 = vrot.slane %v833_v51, 2 }
 0x1e3   : > { %v674_v62 = vadd.f32 1e-09, %v660_v23  ;;  %v675_v43 = vadd.f32 1e-09, %v673_v29 }
 0x1e4   : > { %v835_v2 = vadd.f32 %v834_v52, %v833_v51  ;;  %v849_v52 = vand.u32 2147483648, %v1973_v3 }
 0x1e5   : > { %1359 = vrcp.f32 %v674_v62  ;;  %v685_v37 = vand.u32 2147483647, %v674_v62  ;;  %v687_v51 = vand.u32 2147483648, %v674_v62  ;;  %v700_v29 = vand.u32 2147483647, %v675_v43 }
 0x1e6   : > { %1361 = vrcp.f32 %v675_v43  ;;  %v1976_v35 = vpop.eup %1357  ;;  %v836_v63 = vrot.slane %v835_v2, 1  ;;  %v702_v33 = vand.u32 2147483648, %v675_v43  ;;  %vm681_vm3 = vweird.f32 %v674_v62 }
 0x1e7   : > { %v839_v12 = vmul.f32 %v1976_v35, %v1973_v3  ;;  %vm696_vm4 = vweird.f32 %v675_v43  ;;  %vm844_vm6 = vweird.f32 %v1976_v35  ;;  %vm686_vm8 = vcmp.eq.f32.partialorder %v685_v37, 8.507059e+37  ;;  %v2239_v37 = vld [vmem:[#allocation5_spill] sm:$0xff] }
 0x1e8   : > { %v1978_v36 = vadd.f32 %v836_v63, %v835_v2  ;;  %v847_v2 = vand.u32 2147483647, %v1973_v3  ;;  %vm701_vm9 = vcmp.eq.f32.partialorder %v700_v29, 8.507059e+37  ;;  %vm2002_vm13 = vmor %vm843_vm1, %vm844_vm6  ;;  %vm900_vm1 = vcmask 523264  }
 0x1e9   : > { %v840_v25 = vsub.f32 1.0, %v839_v12  ;;  %v688_v12 = vor.u32 1.1754944e-38, %v687_v51 }
 0x1ea   : > { %1363 = vrcp.f32 %v1978_v36  ;;  %vm858_vm10 = vweird.f32 %v1978_v36  ;;  %vm848_vm15 = vcmp.eq.f32.partialorder %v847_v2, 8.507059e+37  ;;  %v2235_v2 = vld [vmem:[#allocation9_spill] sm:$0xff] }
 0x1eb   : > { %v1360_v22 = vpop.eup %1359  ;;  %v841_v30 = vmul.f32 %v1976_v35, %v840_v25 }
 0x1ec   : > { %v1362_v57 = vpop.eup %1361  ;;  %v677_v47 = vmul.f32 %v1360_v22, %v674_v62  ;;  %vm682_vm2 = vweird.f32 %v1360_v22  ;;  %v703_v62 = vor.u32 1.1754944e-38, %v702_v33  ;;  %v716_v33 = vmul.f32 %v1896_v56, %v1506_v27 }
 0x1ed   : > { %v692_v8 = vmul.f32 %v1362_v57, %v675_v43  ;;  %vm697_vm5 = vweird.f32 %v1362_v57  ;;  %vm683_vm7 = vmor %vm681_vm3, %vm682_vm2  ;;  %v864_v43 = vand.u32 2147483648, %v1978_v36  ;;  %v842_v48 = vadd.f32 %v1976_v35, %v841_v30 }
 0x1ee   : > { %v678_v20 = vsub.f32 1.0, %v677_v47  ;;  %vm698_vm11 = vmor %vm696_vm4, %vm697_vm5  ;;  %vm1022_vm2 = vcmask 1040384  }
 0x1ef   : > { %v693_v23 = vsub.f32 1.0, %v692_v8 }
 0x1f0   : > { %v679_v63 = vmul.f32 %v1360_v22, %v678_v20  ;;  %v1364_v49 = vpop.eup %1363 }
 0x1f1   : > { %v694_v34 = vmul.f32 %v1362_v57, %v693_v23  ;;  %v854_v16 = vmul.f32 %v1364_v49, %v1978_v36  ;;  %vm859_vm12 = vweird.f32 %v1364_v49 }
 0x1f2   : > { %v680_v55 = vadd.f32 %v1360_v22, %v679_v63  ;;  %vm2012_vm14 = vmor %vm858_vm10, %vm859_vm12 }
 0x1f3   : > { %v695_v47 = vadd.f32 %v1362_v57, %v694_v34  ;;  %v855_v8 = vsub.f32 1.0, %v854_v16  ;;  %v850_v34 = vor.u32 1.1754944e-38, %v849_v52  ;;  %v2233_v52 = vld [vmem:[#allocation11_spill] sm:$0xff] }
 0x1f4   : > { %v684_v20 = vsel %vm683_vm7, %v1360_v22, %v680_v55  ;;  %v862_v22 = vand.u32 2147483647, %v1978_v36  ;;  %v865_v36 = vor.u32 1.1754944e-38, %v864_v43 }
 0x1f5   : > { %v689_v25 = vsel %vm686_vm8, %v688_v12, %v684_v20  ;;  %v699_v23 = vsel %vm698_vm11, %v1362_v57, %v695_v47  ;;  %v856_v6 = vmul.f32 %v1364_v49, %v855_v8  ;;  %v719_v57 = vmul.f32 %v1933_v24, %v1514_v31  ;;  %v2232_v31 = vld [vmem:[#allocation10_spill] sm:$0xff]  ;;  %v2237_v20 = vld [vmem:[#allocation7_spill] sm:$0xff] }
 0x1f6   : > { %v736_v63 = vmul.f32 %v720_v53, %v689_v25  ;;  %v1996_v61 = vsel %vm701_vm9, %v703_v62, %v699_v23  ;;  %v734_v3 = vmul.f32 %v718_v14, %v689_v25  ;;  %v846_v24 = vsel %vm2002_vm13, %v1976_v35, %v842_v48  ;;  %v2236_v47 = vld [vmem:[#allocation6_spill] sm:$0xff]  ;;  %v2238_v23 = vld [vmem:[#allocation4_spill] sm:$0xff] }
 0x1f7   : > { %v737_v51 = vmul.f32 %v721_v39, %v1996_v61  ;;  %v857_v29 = vadd.f32 %v1364_v49, %v856_v6  ;;  %v735_v30 = vmul.f32 %v719_v57, %v1996_v61  ;;  %v717_v39 = vmul.f32 %v1908_v44, %v1508_v28  ;;  %v2234_v44 = vld [vmem:[#allocation8_spill] sm:$0xff] }
 0x1f8   : > { %912 = vmatpush.msrb.mxu2 %v736_v63  ;;  %v714_v6 = vmul.f32 %v1847_v26, %v2232_v31  ;;  %v732_v14 = vmul.f32 %v716_v33, %v689_v25  ;;  %vm863_vm0 = vcmp.eq.f32.partialorder %v862_v22, 8.507059e+37  ;;  %v715_v28 = vmul.f32 %v1852_v50, %v2233_v52  ;;  %v2250_v52 = vld [vmem:[#allocation21_spill] sm:$0xff] }
 0x1f9   : > { %932 = vmatpush.msrb.mxu3 %v737_v51  ;;  %v861_v27 = vsel %vm2012_vm14, %v1364_v49, %v857_v29  ;;  %v733_v56 = vmul.f32 %v717_v39, %v1996_v61  ;;  %v712_v16 = vmul.f32 %v1785_v7, %v2234_v44  ;;  %v2033_v48 = vsel %vm848_vm15, %v850_v34, %v846_v24  ;;  %v2241_v29 = vld [vmem:[#allocation3_spill] sm:$0xff] }
 0x1fa   : > { %913 = vmatpush.msrb.mxu2 %v734_v3  ;;  %v730_v26 = vmul.f32 %v714_v6, %v689_v25  ;;  %v731_v35 = vmul.f32 %v715_v28, %v1996_v61  ;;  %v713_v49 = vmul.f32 %v1788_v46, %v2235_v2  ;;  %v2038_v55 = vsel %vm863_vm0, %v865_v36, %v861_v27  ;;  %v2249_v27 = vld [vmem:[#allocation12_spill] sm:$0xff]  ;;  %v2253_v2 = vld [vmem:[#allocation19_spill] sm:$0xff] }
 0x1fb   : > { %933 = vmatpush.msrb.mxu3 %v735_v30  ;;  %v728_v12 = vmul.f32 %v712_v16, %v689_v25  ;;  %v710_v50 = vmul.f32 %v1771_v59, %v2236_v47  ;;  %v711_v7 = vmul.f32 %v1774_v42, %v2237_v20  ;;  %v882_v62 = vmul.f32 %v1925_v21, %v2033_v48  ;;  %v2240_v42 = vld [vmem:[#allocation2_spill] sm:$0xff]  ;;  %v2243_v30 = vld [vmem:[#allocation16_spill] sm:$0xff] }
 0x1fc   : > { %914 = vmatpush.msrb.mxu2 %v732_v14  ;;  %v729_v8 = vmul.f32 %v713_v49, %v1996_v61  ;;  %v708_v46 = vmul.f32 %v1748_v19, %v2238_v23  ;;  %v883_v63 = vmul.f32 %v1969_v1, %v2038_v55  ;;  %v709_v22 = vmul.f32 %v1755_v18, %v2239_v37  ;;  %v2252_v16 = vld [vmem:[#allocation24_spill] sm:$0xff]  ;;  %v2256_v20 = vld [vmem:[#allocation18_spill] sm:$0xff]  ;;  %v1374_v23 = vld [vmem:[%s1430_s23 + $0x8] sm:$0xff] }
 0x1fd   : > { %934 = vmatpush.msrb.mxu3 %v733_v56  ;;  %v726_v43 = vmul.f32 %v710_v50, %v689_v25  ;;  %v727_v59 = vmul.f32 %v711_v7, %v1996_v61  ;;  %v706_v57 = vmul.f32 %v1763_v58, %v2240_v42  ;;  %v880_v21 = vmul.f32 %v1922_v4, %v2033_v48  ;;  %v236_v58 = vld [vmem:[%s2154_s1] sm:$0xff]  ;;  %v2255_v50 = vld [vmem:[#allocation17_spill] sm:$0xff] }
 0x1fe   : > { %915 = vmatpush.msrb.mxu2 %v730_v26  ;;  %v724_v51 = vmul.f32 %v708_v46, %v689_v25  ;;  %v725_v19 = vmul.f32 %v709_v22, %v1996_v61  ;;  %v707_v1 = vmul.f32 %v1767_v41, %v2241_v29  ;;  %v881_v53 = vmul.f32 %v1965_v60, %v2038_v55  ;;  %v2251_v26 = vld [vmem:[#allocation13_spill] sm:$0xff]  ;;  %v1373_v7 = vld [vmem:[%s1430_s23] sm:$0xff] }
 0x1ff   : > { %935 = vmatpush.msrb.mxu3 %v731_v35  ;;  %v898_v3 = vmul.f32 %v882_v62, %v1687_v13  ;;  %v722_v18 = vmul.f32 %v706_v57, %v689_v25  ;;  %v878_v4 = vmul.f32 %v1917_v0, %v2033_v48  ;;  %v899_v33 = vmul.f32 %v883_v63, %v1692_v15 }
 0x200   : > { %916 = vmatpush.msrb.mxu2 %v728_v12  ;;  %v723_v41 = vmul.f32 %v707_v1, %v1996_v61  ;;  %v879_v60 = vmul.f32 %v1963_v54, %v2038_v55  ;;  %v896_v13 = vmul.f32 %v880_v21, %v1660_v38  ;;  %v876_v25 = vmul.f32 %v1912_v45, %v2033_v48  ;;  %v2242_v54 = vld [vmem:[#allocation23_spill] sm:$0xff]  ;;  %v2254_v12 = vld [vmem:[#allocation20_spill] sm:$0xff] }
 0x201   : > { %936 = vmatpush.msrb.mxu3 %v729_v8  ;;  %v897_v34 = vmul.f32 %v881_v53, %v1663_v40  ;;  %v877_v15 = vmul.f32 %v1960_v9, %v2038_v55  ;;  %v894_v61 = vmul.f32 %v878_v4, %v1642_v10  ;;  %v874_v0 = vmul.f32 %v1905_v17, %v2033_v48  ;;  %v2244_v10 = vld [vmem:[#allocation26_spill] sm:$0xff] }
 0x202   : > { %917 = vmatpush.msrb.mxu2 %v726_v43  ;;  %v895_v38 = vmul.f32 %v879_v60, %v1645_v11  ;;  %v875_v45 = vmul.f32 %v1953_v32, %v2038_v55  ;;  %v892_v40 = vmul.f32 %v876_v25, %v1636_v5  ;;  %v872_v9 = vmul.f32 %v2242_v54, %v2033_v48  ;;  %v2245_v17 = vld [vmem:[#allocation14_spill] sm:$0xff]  ;;  %v2247_v32 = vld [vmem:[#allocation15_spill] sm:$0xff]  ;;  %v2248_v5 = vld [vmem:[#allocation25_spill] sm:$0xff] }
 0x203   : > { %937 = vmatpush.msrb.mxu3 %v727_v59  ;;  %v893_v39 = vmul.f32 %v877_v15, %v2243_v30  ;;  %v873_v31 = vmul.f32 %v2244_v10, %v2038_v55  ;;  %v890_v6 = vmul.f32 %v874_v0, %v2245_v17  ;;  %v2246_v11 = vld [vmem:[#allocation22_spill] sm:$0xff]  ;;  %v871_v14 = vmul.f32 %v2248_v5, %v2038_v55 }
 0x204   : > { %918 = vmatpush.msrb.mxu2 %v724_v51  ;;  %v870_v24 = vmul.f32 %v2246_v11, %v2033_v48  ;;  %v891_v36 = vmul.f32 %v875_v45, %v2247_v32  ;;  %v888_v56 = vmul.f32 %v872_v9, %v2249_v27  ;;  %v868_v28 = vmul.f32 %v2250_v52, %v2033_v48 }
 0x205   : > { %938 = vmatpush.msrb.mxu3 %v725_v19  ;;  %v889_v44 = vmul.f32 %v873_v31, %v2251_v26  ;;  %v869_v35 = vmul.f32 %v2252_v16, %v2038_v55  ;;  %v887_v47 = vmul.f32 %v871_v14, %v2254_v12 }
 0x206   : > { %919 = vmatpush.msrb.mxu2 %v722_v18  ;;  %v886_v49 = vmul.f32 %v870_v24, %v2253_v2  ;;  %v884_v8 = vmul.f32 %v868_v28, %v2255_v50 }
 0x207   : > { %939 = vmatpush.msrb.mxu3 %v723_v41  ;;  %1242 = vmatmul.msk.f32.vlgmr.msrb.gmra.mxu2 %vm900_vm1, %v236_v58  ;;  %v885_v48 = vmul.f32 %v869_v35, %v2256_v20 }
 0x208   : > { %1243 = vmatmul.msk.f32.vlgmr.msrb.gmra.mxu3 %vm900_vm1, %v236_v58  ;;  %952 = vmatpush.msra.mxu2 %v898_v3 }
 0x209   : > { %972 = vmatpush.msra.mxu3 %v899_v33 }
 0x20a   : > { %953 = vmatpush.msra.mxu2 %v896_v13 }
 0x20b   : > { %973 = vmatpush.msra.mxu3 %v897_v34 }
 0x20c   : > { %954 = vmatpush.msra.mxu2 %v894_v61  ;;  %v1375_v61 = vld [vmem:[%s1425_s20] sm:$0xff] }
 0x20d   : > { %974 = vmatpush.msra.mxu3 %v895_v38  ;;  %v1376_v38 = vld [vmem:[%s1425_s20 + $0x8] sm:$0xff] }
 0x20e   : > { %955 = vmatpush.msra.mxu2 %v892_v40 }
 0x20f   : > { %975 = vmatpush.msra.mxu3 %v893_v39 }
 0x210   : > { %956 = vmatpush.msra.mxu2 %v890_v6 }
 0x211   : > { %976 = vmatpush.msra.mxu3 %v891_v36 }
 0x212   : > { %957 = vmatpush.msra.mxu2 %v888_v56 }
 0x213   : > { %977 = vmatpush.msra.mxu3 %v889_v44 }
 0x214   : > { %958 = vmatpush.msra.mxu2 %v886_v49 }
 0x215   : > { %978 = vmatpush.msra.mxu3 %v887_v47 }
 0x216   : > { %959 = vmatpush.msra.mxu2 %v884_v8 }
 0x217   : > { %979 = vmatpush.msra.mxu3 %v885_v48  ;;  %1244 = vmatmul.msk.f32.vlgmr.msra.gmra.mxu2 %vm900_vm1, %v236_v58 }
 0x218   : > { %1245 = vmatmul.msk.f32.vlgmr.msra.gmra.mxu3 %vm900_vm1, %v236_v58 }
 0x28a   : > { %v921_v55 = vpop.f32.mrf.mxu2 }
 0x28b   : > { %v984_v62 = vadd.f32 %v1373_v7, %v921_v55  ;;  %v941_v43 = vpop.f32.mrf.mxu3 }
 0x28c   : > { %v985_v46 = vadd.f32 %v1374_v23, %v941_v43 }
 0x28d   : > { %v988_v63 = vmul.f32 %v984_v62, %v984_v62 }
 0x28e   : > { %v989_v59 = vmul.f32 %v985_v46, %v985_v46 }
 0x28f   : > { %v990_v37 = vrot.slane %v988_v63, 4 }
 0x290   : > { %v996_v22 = vrot.slane %v989_v59, 4 }
 0x291   : > { %v991_v51 = vadd.f32 %v990_v37, %v988_v63 }
 0x292   : > { %v997_v42 = vadd.f32 %v996_v22, %v989_v59 }
 0x293   : > { %v992_v57 = vrot.slane %v991_v51, 2 }
 0x294   : > { %v998_v21 = vrot.slane %v997_v42, 2 }
 0x295   : > { %v993_v19 = vadd.f32 %v992_v57, %v991_v51 }
 0x296   : > { %v999_v29 = vadd.f32 %v998_v21, %v997_v42 }
 0x297   : > { %v994_v1 = vrot.slane %v993_v19, 1 }
 0x298   : > { %v1000_v53 = vrot.slane %v999_v29, 1 }
 0x299   : > { %v995_v3 = vadd.f32 %v994_v1, %v993_v19 }
 0x29a   : > { %v1001_v18 = vadd.f32 %v1000_v53, %v999_v29  ;;  %v961_v34 = vpop.f32.mrf.mxu2 }
 0x29b   : > { %v2113_v58 = vmul.f32 0.125, %v995_v3  ;;  %v981_v15 = vpop.f32.mrf.mxu3  ;;  %v986_v0 = vadd.f32 %v1375_v61, %v961_v34 }
 0x29c   : > { %v2115_v4 = vmul.f32 0.125, %v1001_v18  ;;  %v987_v45 = vadd.f32 %v1376_v38, %v981_v15 }
 0x29d   : > { %v1020_v33 = vmul.f32 %v2113_v58, %v2113_v58  ;;  %v1004_v40 = vmul.f32 %v986_v0, %v986_v0 }
 0x29e   : > { %v1021_v41 = vmul.f32 %v2115_v4, %v2115_v4  ;;  %v1005_v54 = vmul.f32 %v987_v45, %v987_v45 }
 0x29f   : > { %v1023_v60 = vsel %vm1022_vm2, %v1020_v33, 0.0  ;;  %v1006_v9 = vrot.slane %v1004_v40, 4 }
 0x2a0   : > { %v1024_v13 = vsel %vm1022_vm2, %v1021_v41, 0.0  ;;  %v1012_v30 = vrot.slane %v1005_v54, 4 }
 0x2a1   : > { %v1025_v25 = vadd.f32 %v1024_v13, %v1023_v60  ;;  %v1007_v39 = vadd.f32 %v1006_v9, %v1004_v40 }
 0x2a2   : > { %v1013_v10 = vadd.f32 %v1012_v30, %v1005_v54 }
 0x2a3   : > { %1026 = vadd.xlane.f32.xlu1 %v1025_v25  ;;  %v1008_v31 = vrot.slane %v1007_v39, 2 }
 0x2a4   : > { %v1014_v17 = vrot.slane %v1013_v10, 2 }
 0x2a5   : > { %v1009_v6 = vadd.f32 %v1008_v31, %v1007_v39 }
 0x2a6   : > { %v1015_v11 = vadd.f32 %v1014_v17, %v1013_v10 }
 0x2a7   : > { %v1010_v24 = vrot.slane %v1009_v6, 1 }
 0x2a8   : > { %v1016_v32 = vrot.slane %v1015_v11, 1 }
 0x2a9   : > { %v1011_v36 = vadd.f32 %v1010_v24, %v1009_v6 }
 0x2aa   : > { %v1017_v5 = vadd.f32 %v1016_v32, %v1015_v11 }
 0x2ab   : > { %v2125_v14 = vmul.f32 0.125, %v1011_v36 }
 0x2ac   : > { %v2127_v27 = vmul.f32 0.125, %v1017_v5 }
 0x2ad   : > { %v1066_v56 = vmul.f32 %v2125_v14, %v2125_v14 }
 0x2ae   : > { %v1067_v52 = vmul.f32 %v2127_v27, %v2127_v27 }
 0x2af   : > { %v1068_v28 = vsel %vm1022_vm2, %v1066_v56, 0.0 }
 0x2b0   : > { %v1069_v26 = vsel %vm1022_vm2, %v1067_v52, 0.0 }
 0x2b1   : > { %v1070_v44 = vadd.f32 %v1069_v26, %v1068_v28 }
 0x2b3   : > { %1071 = vadd.xlane.f32.xlu2 %v1070_v44 }
 0x316   : > { %v1027_v16 = vpop.xlane.xlu1 %1026 }
 0x317   : > { %v1028_v35 = vrot.slane %v1027_v16, 4 }
 0x319   : > { %v1029_v2 = vadd.f32 %v1028_v35, %v1027_v16 }
 0x31b   : > { %v1030_v49 = vrot.slane %v1029_v2, 2 }
 0x31d   : > { %v1031_v12 = vadd.f32 %v1030_v49, %v1029_v2 }
 0x31f   : > { %v1032_v47 = vrot.slane %v1031_v12, 1 }
 0x321   : > { %v1033_v50 = vadd.f32 %v1032_v47, %v1031_v12 }
 0x323   : > { %1254 = vpush %v1033_v50 }
 0x326   : > { %v1072_v37 = vpop.xlane.xlu2 %1071 }
 0x327   : > { %v1073_v22 = vrot.slane %v1072_v37, 4 }
 0x329   : > { %v1074_v42 = vadd.f32 %v1073_v22, %v1072_v37 }
 0x32b   : > { %v1075_v57 = vrot.slane %v1074_v42, 2 }
 0x32d   : > { %v1076_v29 = vadd.f32 %v1075_v57, %v1074_v42 }
 0x32f   : > { %v1077_v33 = vrot.slane %v1076_v29, 1 }
 0x331   : > { %v1078_v34 = vadd.f32 %v1077_v33, %v1076_v29 }
 0x354   : > { %s1255_s20 = spop %1254 }
 0x355   : > { %v1035_v8 = vstv %s1255_s20 }
 0x356   : > { %1365 = vrsqrt.f32 %v1035_v8  ;;  %vm1043_vm3 = vcmp.eq.f32.partialorder %v1035_v8, inf  ;;  %v1046_v46 = vand.u32 2147483648, %v1035_v8  ;;  %vm1045_vm4 = vcmp.eq.f32.partialorder %v1035_v8, 0.0 }
 0x35c   : > { %v1366_v20 = vpop.eup %1365 }
 0x35d   : > { %v1037_v48 = vmul.f32 %v1366_v20, %v1035_v8 }
 0x35f   : > { %v1038_v55 = vmul.f32 %v1366_v20, %v1037_v48 }
 0x361   : > { %v1039_v7 = vmul.f32 0.5, %v1038_v55 }
 0x363   : > { %v1040_v62 = vsub.f32 1.5, %v1039_v7 }
 0x365   : > { %v1041_v43 = vmul.f32 %v1366_v20, %v1040_v62 }
 0x367   : > { %v1042_v23 = vmul.f32 %v1041_v43, %v1035_v8 }
 0x369   : > { %v1044_v63 = vsel %vm1043_vm3, %v1035_v8, %v1042_v23 }
 0x36a   : > { %v1047_v59 = vsel %vm1045_vm4, %v1046_v46, %v1044_v63 }
 0x36b   : > { %1256 = vpush %v1047_v59 }
 0x39c   : > { %s1257_s23 = spop %1256 }
 0x39d   : > { %s1049_s11 = smax.f32 %s1385_s10, %s1257_s23 }
 0x39e   : > { %v1050_v51 = vstv %s1049_s11 }
 0x39f   : > { %1367 = vrcp.f32 %v1050_v51  ;;  %v1062_v53 = vand.u32 2147483648, %v1050_v51  ;;  %v1060_v18 = vand.u32 2147483647, %v1050_v51  ;;  %vm1056_vm6 = vweird.f32 %v1050_v51 }
 0x3a1   : > { %v1063_v60 = vor.u32 1.1754944e-38, %v1062_v53  ;;  %vm1061_vm8 = vcmp.eq.f32.partialorder %v1060_v18, 8.507059e+37 }
 0x3a5   : > { %v1368_v21 = vpop.eup %1367 }
 0x3a6   : > { %v1052_v19 = vmul.f32 %v1368_v21, %v1050_v51  ;;  %vm1057_vm5 = vweird.f32 %v1368_v21 }
 0x3a7   : > { %vm1058_vm7 = vmor %vm1056_vm6, %vm1057_vm5 }
 0x3a8   : > { %v1053_v1 = vsub.f32 1.0, %v1052_v19 }
 0x3aa   : > { %v1054_v3 = vmul.f32 %v1368_v21, %v1053_v1 }
 0x3ac   : > { %v1055_v41 = vadd.f32 %v1368_v21, %v1054_v3 }
 0x3ae   : > { %v1059_v13 = vsel %vm1058_vm7, %v1368_v21, %v1055_v41 }
 0x3af   : > { %v1064_v25 = vsel %vm1061_vm8, %v1063_v60, %v1059_v13 }
 0x3b0   : > { %1258 = vpush %v1064_v25 }
 0x3b1   : > { %1260 = vpush %v1078_v34 }
 0x3e1   : > { %s2136_s12 = spop %1258 }
 0x3e2   : > { %s1261_s13 = spop %1260  ;;  %v1111_v26 = vstv %s2136_s12 }
 0x3e3   : > { %v1080_v15 = vstv %s1261_s13  ;;  %v1112_v16 = vmul.f32 %v1111_v26, %v2113_v58  ;;  %v1113_v35 = vmul.f32 %v1111_v26, %v2115_v4 }
 0x3e4   : > { %1369 = vrsqrt.f32 %v1080_v15  ;;  %vm1088_vm9 = vcmp.eq.f32.partialorder %v1080_v15, inf  ;;  %v1091_v30 = vand.u32 2147483648, %v1080_v15  ;;  %vm1090_vm10 = vcmp.eq.f32.partialorder %v1080_v15, 0.0 }
 0x3ea   : > { %v1370_v61 = vpop.eup %1369 }
 0x3eb   : > { %v1082_v0 = vmul.f32 %v1370_v61, %v1080_v15 }
 0x3ed   : > { %v1083_v38 = vmul.f32 %v1370_v61, %v1082_v0 }
 0x3ef   : > { %v1084_v45 = vmul.f32 0.5, %v1083_v38 }
 0x3f1   : > { %v1085_v40 = vsub.f32 1.5, %v1084_v45 }
 0x3f3   : > { %v1086_v54 = vmul.f32 %v1370_v61, %v1085_v40 }
 0x3f5   : > { %v1087_v9 = vmul.f32 %v1086_v54, %v1080_v15 }
 0x3f7   : > { %v1089_v39 = vsel %vm1088_vm9, %v1080_v15, %v1087_v9 }
 0x3f8   : > { %v1092_v10 = vsel %vm1090_vm10, %v1091_v30, %v1089_v39 }
 0x3f9   : > { %1262 = vpush %v1092_v10 }
 0x42a   : > { %s1263_s14 = spop %1262 }
 0x42b   : > { %s1094_s17 = smax.f32 %s1385_s10, %s1263_s14 }
 0x42c   : > { %v1095_v31 = vstv %s1094_s17 }
 0x42d   : > { %1371 = vrcp.f32 %v1095_v31  ;;  %v1107_v24 = vand.u32 2147483648, %v1095_v31  ;;  %v1105_v36 = vand.u32 2147483647, %v1095_v31  ;;  %vm1101_vm12 = vweird.f32 %v1095_v31 }
 0x42f   : > { %v1108_v56 = vor.u32 1.1754944e-38, %v1107_v24  ;;  %vm1106_vm14 = vcmp.eq.f32.partialorder %v1105_v36, 8.507059e+37 }
 0x433   : > { %v1372_v17 = vpop.eup %1371 }
 0x434   : > { %v1097_v6 = vmul.f32 %v1372_v17, %v1095_v31  ;;  %vm1102_vm11 = vweird.f32 %v1372_v17 }
 0x435   : > { %vm1103_vm13 = vmor %vm1101_vm12, %vm1102_vm11 }
 0x436   : > { %v1098_v11 = vsub.f32 1.0, %v1097_v6 }
 0x438   : > { %v1099_v32 = vmul.f32 %v1372_v17, %v1098_v11 }
 0x43a   : > { %v1100_v5 = vadd.f32 %v1372_v17, %v1099_v32 }
 0x43c   : > { %v1104_v52 = vsel %vm1103_vm13, %v1372_v17, %v1100_v5 }
 0x43d   : > { %v1109_v28 = vsel %vm1106_vm14, %v1108_v56, %v1104_v52 }
 0x43e   : > { %1264 = vpush %v1109_v28 }
 0x46f   : > { %s1265_s18 = spop %1264 }
 0x470   : > { %v1114_v44 = vstv %s1265_s18 }
 0x471   : > { %v1115_v2 = vmul.f32 %v1114_v44, %v2125_v14  ;;  %v1116_v49 = vmul.f32 %v1114_v44, %v2127_v27 }
 0x473   : > { %v1117_v12 = vsub.f32 %v1112_v16, %v1115_v2  ;;  %v1118_v47 = vsub.f32 %v1113_v35, %v1116_v49 }
 0x475   : > { %v1119_v50 = vmul.f32 %v1117_v12, %v1117_v12  ;;  %v1120_v8 = vmul.f32 %v1118_v47, %v1118_v47 }
 0x477   : > { %v1121_v20 = vsel %vm1022_vm2, %v1119_v50, 0.0  ;;  %v1122_v48 = vsel %vm1022_vm2, %v1120_v8, 0.0 }
 0x478   : > { %v1123_v55 = vadd.f32 %v1122_v48, %v1121_v20 }
 0x47a   : > { %1124 = vadd.xlane.f32.xlu0 %v1123_v55 }
 0x4ed   : > { %v1125_v7 = vpop.xlane.xlu0 %1124 }
 0x4ee   : > { %v1126_v62 = vrot.slane %v1125_v7, 4 }
 0x4f0   : > { %v1127_v58 = vadd.f32 %v1126_v62, %v1125_v7 }
 0x4f2   : > { %v1128_v43 = vrot.slane %v1127_v58, 2 }
 0x4f4   : > { %v1129_v4 = vadd.f32 %v1128_v43, %v1127_v58 }
 0x4f6   : > { %v1130_v23 = vrot.slane %v1129_v4, 1 }
 0x4f8   : > { %v1131_v14 = vadd.f32 %v1130_v23, %v1129_v4 }
 0x4fa   : > { %1266 = vpush %v1131_v14 }
 0x52b   : > { %s1267_s25 = spop %1266 }
 0x52c   : > { %v1133_v27 = vstv %s1267_s25 }
 0x52d   : > { %1134 = vst [vmem:[%s215_s24] sm:$0xff] %v1133_v27 }
 0x52e PF: > { %s14_s15 = sadd.s32 1, %s1383_s15  }
 0x52f   : > { %p11_p4 = scmp.ge.s32.totalorder %s14_s15, 4  }
 0x531   :  { %13 = sbr.rel (!%p11_p4) target bundleno = 1 (0x1), region = 69 }

</bundles_post_ra>
